<compile_context>
chip_gen: v7x
topology: tpu7x:2x2x1
jax: 0.10.0
libtpu: 0.0.40
codegen_flags: <defaults>
</compile_context>

<pallas_src>
import functools

import jax
import jax.numpy as jnp
from jax import lax
from jax.experimental import pallas as pl
from jax.experimental.pallas import tpu as pltpu

LANE = 128


def _round_up(a, b):
    return (a + b - 1) // b * b


@functools.lru_cache(maxsize=None)
def _vmem_limit_bytes():
    # 3/4 of physical VMEM, capped at 100 MiB: ~96 MiB on v5e/v6e, 48 MiB on
    # v7x.  Falls back to a safe 48 MiB if the query is unavailable.
    try:
        cap = int(getattr(pltpu.get_tpu_info(), "vmem_capacity_bytes", 0))
    except Exception:
        cap = 0
    if cap <= 0:
        return 48 * 1024 * 1024
    return max(32 * 1024 * 1024, min(cap * 3 // 4, 100 * 1024 * 1024))


def _compiler_params():
    return pltpu.CompilerParams(dimension_semantics=("parallel",),
                                vmem_limit_bytes=_vmem_limit_bytes())


def _pick_tm(m, tm_max=256, tm_min=64):
    """Row tile: multiple of 16, and >=2 grid steps when possible (v7x TCs)."""
    tm = tm_max
    while tm > tm_min and (m + tm - 1) // tm < 2:
        tm //= 2
    return tm


# ---------------------------------------------------------------------------
# Kernel 1: tiled (conv-as-matmul) + per-tile BatchNorm partial statistics.
# ---------------------------------------------------------------------------
def _matmul_stats_kernel(p_ref, w_ref, y_ref, stats_ref):
    # p_ref: (TM, K) bf16; w_ref: (K, C) bf16 (constant index_map -> resident).
    acc = jnp.dot(p_ref[...], w_ref[...], preferred_element_type=jnp.float32)
    s = jnp.sum(acc, axis=0, keepdims=True)          # (1, C) partial sum
    q = jnp.sum(acc * acc, axis=0, keepdims=True)    # (1, C) partial sum-of-sq
    stats_ref[...] = jnp.concatenate([s, q], axis=0)[None]   # (1, 2, C) f32
    y_ref[...] = acc.astype(y_ref.dtype)             # bf16 activation output


def _matmul_with_stats(p, w, tm):
    mp, k = p.shape
    c = w.shape[1]
    nt = mp // tm
    # TODO(synk): for large-Cin real ResNet layers, replace wrapper-side im2col
    # with in-kernel tap accumulation (implicit GEMM) to avoid the 9x patch
    # HBM blowup entirely.
    return pl.pallas_call(
        _matmul_stats_kernel,
        grid=(nt,),
        in_specs=[pl.BlockSpec((tm, k), lambda i: (i, 0)),
                  pl.BlockSpec((k, c), lambda i: (0, 0))],
        out_specs=[pl.BlockSpec((tm, c), lambda i: (i, 0)),
                   pl.BlockSpec((1, 2, c), lambda i: (i, 0, 0))],
        out_shape=[jax.ShapeDtypeStruct((mp, c), jnp.bfloat16),
                   jax.ShapeDtypeStruct((nt, 2, c), jnp.float32)],
        compiler_params=_compiler_params(),
    )(p, w)


# ---------------------------------------------------------------------------
# Kernel 2: final combine  relu(bn2(y2) + shortcut)  (two variants).
# ---------------------------------------------------------------------------
def _combine_conv_sc_kernel(y_ref, sc_ref, s2_ref, b2_ref, ssc_ref, bsc_ref,
                            o_ref):
    main = y_ref[...].astype(jnp.float32) * s2_ref[...] + b2_ref[...]
    short = sc_ref[...].astype(jnp.float32) * ssc_ref[...] + bsc_ref[...]
    o_ref[...] = jnp.maximum(main + short, 0.0).astype(o_ref.dtype)


def _combine_identity_kernel(y_ref, sc_ref, s2_ref, b2_ref, o_ref):
    main = y_ref[...].astype(jnp.float32) * s2_ref[...] + b2_ref[...]
    o_ref[...] = jnp.maximum(main + sc_ref[...].astype(jnp.float32),
                             0.0).astype(o_ref.dtype)


def _combine(y2, sc, scale2, bias2, scale_sc, bias_sc, tm):
    mp, c = y2.shape
    nt = mp // tm
    row = pl.BlockSpec((tm, c), lambda i: (i, 0))
    vec = pl.BlockSpec((1, c), lambda i: (0, 0))
    if scale_sc is None:                       # identity shortcut
        kernel = _combine_identity_kernel
        ins = (y2, sc, scale2, bias2)
        in_specs = [row, row, vec, vec]
    else:                                      # 1x1-conv + bn shortcut
        kernel = _combine_conv_sc_kernel
        ins = (y2, sc, scale2, bias2, scale_sc, bias_sc)
        in_specs = [row, row, vec, vec, vec, vec]
    return pl.pallas_call(
        kernel,
        grid=(nt,),
        in_specs=in_specs,
        out_specs=pl.BlockSpec((tm, c), lambda i: (i, 0)),
        out_shape=jax.ShapeDtypeStruct((mp, c), jnp.float32),
        compiler_params=_compiler_params(),
    )(*ins)


# ---------------------------------------------------------------------------
# Wrapper-side helpers (pure XLA preprocessing / per-channel folding).
# ---------------------------------------------------------------------------
def _im2col_3x3(x_nhwc, stride):
    """3x3, pad=1, given stride -> (N*Ho*Wo, 9*C), column order (ky, kx, c).

    Only real channels are kept per tap; the caller pads K once at the end
    (whole-K padding), NOT per tap.
    """
    n, h, w, c = x_nhwc.shape
    ho = (h + 2 - 3) // stride + 1
    wo = (w + 2 - 3) // stride + 1
    xp = jnp.pad(x_nhwc, ((0, 0), (1, 1), (1, 1), (0, 0)))
    taps = []
    for ky in range(3):
        for kx in range(3):
            taps.append(xp[:, ky:ky + (ho - 1) * stride + 1:stride,
                              kx:kx + (wo - 1) * stride + 1:stride, :])
    pat = jnp.stack(taps, axis=3)                  # (N, Ho, Wo, 9, C)
    return pat.reshape(n * ho * wo, 9 * c)


def _pad_patch(p, mp, k_pad):
    m, k = p.shape
    return jnp.pad(p, ((0, mp - m), (0, k_pad - k))).astype(jnp.bfloat16)


def _flatten_conv_w(w, k_pad, cout_p):
    kh, kw, cin, cout = w.shape
    wf = w.reshape(kh * kw * cin, cout)            # row order (ky, kx, cin)
    wf = jnp.pad(wf, ((0, k_pad - kh * kw * cin), (0, cout_p - cout)))
    return wf.astype(jnp.bfloat16)


def _fold_bn(stats, m_real, gamma, beta, eps, c_pad=None):
    """Fold per-tile (sum, sum_sq) into per-channel (scale, bias).

    TODO(synk): the E[x^2]-E[x]^2 form cancels for very large M with
    non-centered activations; switch to a shifted two-pass form for real nets.
    """
    c = gamma.size
    s = jnp.sum(stats[:, 0, :c], axis=0)
    q = jnp.sum(stats[:, 1, :c], axis=0)
    mean = s / m_real
    var = jnp.maximum(q / m_real - mean * mean, 0.0)     # biased variance
    scale = gamma.reshape(-1) * lax.rsqrt(var + eps)
    bias = beta.reshape(-1) - mean * scale
    if c_pad is not None and c_pad > c:
        scale = jnp.pad(scale, (0, c_pad - c))
        bias = jnp.pad(bias, (0, c_pad - c))
    return scale.reshape(1, -1), bias.reshape(1, -1)


# ---------------------------------------------------------------------------
# BasicBlock forward.
# ---------------------------------------------------------------------------
def basic_block_forward(x_nchw, params, *, stride=1, eps=1e-5):
    # TODO(synk): when chaining blocks in a full ResNet, keep NHWC end-to-end
    # and drop these NCHW<->NHWC transposes (extra HBM round-trip each).
    x = jnp.transpose(x_nchw, (0, 2, 3, 1)).astype(jnp.float32)   # NHWC
    n, h, w, cin = x.shape
    w1, w2 = params["w1"], params["w2"]
    c1, c2 = w1.shape[3], w2.shape[3]
    has_sc_conv = (stride != 1) or (cin != c2)

    ho = (h + 2 - 3) // stride + 1
    wo = (w + 2 - 3) // stride + 1
    m = n * ho * wo
    tm = _pick_tm(m)
    mp = _round_up(m, tm)

    c1_p = _round_up(c1, LANE)
    c2_p = _round_up(c2, LANE)
    k1 = _round_up(9 * cin, LANE)       # whole-K padding (NOT 9 * round_up(cin))
    k2 = _round_up(9 * c1, LANE)

    # ---- conv1 (3x3, stride) + BN1 partial stats ----
    pat1 = _pad_patch(_im2col_3x3(x, stride), mp, k1)
    y1, st1 = _matmul_with_stats(pat1, _flatten_conv_w(w1, k1, c1_p), tm)
    scale1, bias1 = _fold_bn(st1, m, params["g1"], params["b1"], eps)

    # ---- bn1 + relu as plain XLA elementwise (fused into conv2's im2col) ----
    out1 = jnp.maximum(y1[:m, :c1].astype(jnp.float32) * scale1 + bias1, 0.0)
    out1 = out1.reshape(n, ho, wo, c1).astype(jnp.bfloat16)

    # ---- conv2 (3x3, stride=1) + BN2 partial stats ----
    pat2 = _pad_patch(_im2col_3x3(out1, 1), mp, k2)
    y2, st2 = _matmul_with_stats(pat2, _flatten_conv_w(w2, k2, c2_p), tm)
    scale2, bias2 = _fold_bn(st2, m, params["g2"], params["b2"], eps,
                             c_pad=c2_p)

    # ---- shortcut path ----
    if has_sc_conv:
        cin_p = _round_up(cin, LANE)
        xs = x[:, ::stride, ::stride, :][:, :ho, :wo, :]
        xs = _pad_patch(xs.reshape(m, cin), mp, cin_p)
        wscf = jnp.pad(params["wsc"],
                       ((0, cin_p - cin), (0, c2_p - c2))).astype(jnp.bfloat16)
        ysc, stsc = _matmul_with_stats(xs, wscf, tm)
        scale_sc, bias_sc = _fold_bn(stsc, m, params["gsc"], params["bsc"],
                                     eps, c_pad=c2_p)
        sc_src = ysc                                     # bf16 (mp, c2_p)
    else:
        assert stride == 1 and cin == c2
        sc_src = _pad_patch(x.reshape(m, cin), mp, c2_p)  # identity, bf16
        scale_sc = bias_sc = None

    # ---- bn2(y2) + shortcut, add, relu ----
    out = _combine(y2, sc_src, scale2, bias2, scale_sc, bias_sc, tm)
    out = out[:m, :c2].reshape(n, ho, wo, c2)
    return jnp.transpose(out, (0, 3, 1, 2))


# ---------------------------------------------------------------------------
# Pure-JAX reference (same math as the PyTorch module in train mode, f32).
# ---------------------------------------------------------------------------
def basic_block_ref(x_nchw, params, *, stride=1, eps=1e-5):
    x = jnp.transpose(x_nchw, (0, 2, 3, 1)).astype(jnp.float32)
    cin = x.shape[-1]
    c2 = params["w2"].shape[3]

    def conv(inp, w, s, pad):
        dn = lax.conv_dimension_numbers(inp.shape, w.shape,
                                        ("NHWC", "HWIO", "NHWC"))
        return lax.conv_general_dilated(inp, w, (s, s),
                                        ((pad, pad), (pad, pad)),
                                        dimension_numbers=dn)

    def bn(z, g, b):
        mean = jnp.mean(z, axis=(0, 1, 2), keepdims=True)
        var = jnp.mean((z - mean) ** 2, axis=(0, 1, 2), keepdims=True)
        return ((z - mean) * lax.rsqrt(var + eps) * g.reshape(1, 1, 1, -1)
                + b.reshape(1, 1, 1, -1))

    out = jax.nn.relu(bn(conv(x, params["w1"], stride, 1),
                         params["g1"], params["b1"]))
    out = bn(conv(out, params["w2"], 1, 1), params["g2"], params["b2"])
    if stride != 1 or cin != c2:
        sc = conv(x, params["wsc"].reshape(1, 1, cin, c2), stride, 0)
        sc = bn(sc, params["gsc"], params["bsc"])
    else:
        sc = x
    return jnp.transpose(jax.nn.relu(out + sc), (0, 3, 1, 2))


def _make_params(key, cin, c1, c2, has_sc):
    ks = jax.random.split(key, 9)
    p = {
        "w1": jax.random.normal(ks[0], (3, 3, cin, c1), jnp.float32) * 0.1,
        "g1": jax.random.uniform(ks[1], (1, c1), jnp.float32, 0.5, 1.5),
        "b1": jax.random.normal(ks[2], (1, c1), jnp.float32) * 0.1,
        "w2": jax.random.normal(ks[3], (3, 3, c1, c2), jnp.float32) * 0.1,
        "g2": jax.random.uniform(ks[4], (1, c2), jnp.float32, 0.5, 1.5),
        "b2": jax.random.normal(ks[5], (1, c2), jnp.float32) * 0.1,
    }
    if has_sc:
        p["wsc"] = jax.random.normal(ks[6], (cin, c2), jnp.float32) * 0.1
        p["gsc"] = jax.random.uniform(ks[7], (1, c2), jnp.float32, 0.5, 1.5)
        p["bsc"] = jax.random.normal(ks[8], (1, c2), jnp.float32) * 0.1
    return p


if __name__ == "__main__":
    # bf16 MXU operands + bf16 inter-kernel activations set the numeric floor
    # vs. the pure-f32 reference.
    TOL = 1e-1
    key = jax.random.PRNGKey(0)
    k1, k2, k3, k4, k5, k6 = jax.random.split(key, 6)

    # Case 1: BasicBlock(in_planes=4, planes=8, stride=1) -> 1x1 conv+bn shortcut
    n, cin, h, w = 2, 4, 16, 16
    params = _make_params(k1, cin, 8, 8, has_sc=True)
    x = jax.random.normal(k2, (n, cin, h, w), jnp.float32)
    out = jax.block_until_ready(basic_block_forward(x, params, stride=1))
    ref = basic_block_ref(x, params, stride=1)
    assert out.shape == (n, 8, h, w), out.shape
    err = float(jnp.max(jnp.abs(out - ref)))
    assert err < TOL, f"case1 max abs err {err}"

    # Case 2: BasicBlock(in_planes=8, planes=8, stride=1) -> identity shortcut
    params2 = _make_params(k3, 8, 8, 8, has_sc=False)
    x2 = jax.random.normal(k4, (2, 8, 16, 16), jnp.float32)
    out2 = jax.block_until_ready(basic_block_forward(x2, params2, stride=1))
    ref2 = basic_block_ref(x2, params2, stride=1)
    assert out2.shape == (2, 8, 16, 16), out2.shape
    err2 = float(jnp.max(jnp.abs(out2 - ref2)))
    assert err2 < TOL, f"case2 max abs err {err2}"

    # Case 3: BasicBlock(in_planes=4, planes=8, stride=2) -> strided conv shortcut
    params3 = _make_params(k5, 4, 8, 8, has_sc=True)
    x3 = jax.random.normal(k6, (2, 4, 16, 16), jnp.float32)
    out3 = jax.block_until_ready(basic_block_forward(x3, params3, stride=2))
    ref3 = basic_block_ref(x3, params3, stride=2)
    assert out3.shape == (2, 8, 8, 8), out3.shape
    err3 = float(jnp.max(jnp.abs(out3 - ref3)))
    assert err3 < TOL, f"case3 max abs err {err3}"

    print("KERNEL_OK")
</pallas_src>

<mosaic_0001>
module attributes {stable_mosaic.version = 11 : i64} {
  func.func @_matmul_stats_kernel(%arg0: i32, %arg1: memref<256x128xbf16, #tpu.memory_space<vmem>>, %arg2: memref<128x128xbf16, #tpu.memory_space<vmem>>, %arg3: memref<256x128xbf16, #tpu.memory_space<vmem>>, %arg4: memref<1x2x128xf32, #tpu.memory_space<vmem>>) attributes {dimension_semantics = [#tpu.dimension_semantics<parallel>], iteration_bounds = array<i64: 2>, scalar_prefetch = 0 : i64, scratch_operands = 0 : i64, tpu.core_type = #tpu.core_type<tc>, window_params = [{transform_indices = @transform_0, window_bounds = array<i64: 256, 128>}, {pipeline_mode = #tpu.pipeline_mode<synchronous>, transform_indices = @transform_1, window_bounds = array<i64: 128, 128>}, {transform_indices = @transform_2, window_bounds = array<i64: 256, 128>}, {transform_indices = @transform_3, window_bounds = array<i64: 1, 2, 128>}]} {
    %c0 = arith.constant 0 : index
    %c0_0 = arith.constant 0 : index
    %0 = vector.load %arg1[%c0, %c0_0] : memref<256x128xbf16, #tpu.memory_space<vmem>>, vector<256x128xbf16>
    %c0_1 = arith.constant 0 : index
    %c0_2 = arith.constant 0 : index
    %1 = vector.load %arg2[%c0_1, %c0_2] : memref<128x128xbf16, #tpu.memory_space<vmem>>, vector<128x128xbf16>
    %cst = arith.constant dense<0.000000e+00> : vector<256x128xf32>
    %2 = tpu.matmul %0, %1, %cst {dimension_numbers = #tpu.dot_dimension_numbers<[1], [0], [0], [1], [0, 0, 1, 1], [], []>} : vector<256x128xbf16>, vector<128x128xbf16>, vector<256x128xf32> -> vector<256x128xf32>
    %cst_3 = arith.constant dense<0.000000e+00> : vector<128xf32>
    %3 = vector.multi_reduction <add>, %2, %cst_3 [0] : vector<256x128xf32> to vector<128xf32>
    %4 = vector.shape_cast %3 : vector<128xf32> to vector<1x128xf32>
    %5 = arith.mulf %2, %2 : vector<256x128xf32>
    %cst_4 = arith.constant dense<0.000000e+00> : vector<128xf32>
    %6 = vector.multi_reduction <add>, %5, %cst_4 [0] : vector<256x128xf32> to vector<128xf32>
    %7 = vector.shape_cast %6 : vector<128xf32> to vector<1x128xf32>
    %8 = tpu.concatenate %4, %7 in 0 : vector<1x128xf32>, vector<1x128xf32> -> vector<2x128xf32>
    %9 = vector.shape_cast %8 : vector<2x128xf32> to vector<1x2x128xf32>
    %c0_5 = arith.constant 0 : index
    %c0_6 = arith.constant 0 : index
    %c0_7 = arith.constant 0 : index
    %10 = vector.load %arg4[%c0_5, %c0_6, %c0_7] : memref<1x2x128xf32, #tpu.memory_space<vmem>>, vector<1x2x128xf32>
    tpu.vector_store %arg4[%c0_5, %c0_6, %c0_7], %9 {strides = array<i32>} : memref<1x2x128xf32, #tpu.memory_space<vmem>>, vector<1x2x128xf32>,
    %11 = arith.truncf %2 : vector<256x128xf32> to vector<256x128xbf16>
    %c0_8 = arith.constant 0 : index
    %c0_9 = arith.constant 0 : index
    %12 = vector.load %arg3[%c0_8, %c0_9] : memref<256x128xbf16, #tpu.memory_space<vmem>>, vector<256x128xbf16>
    tpu.vector_store %arg3[%c0_8, %c0_9], %11 {strides = array<i32>} : memref<256x128xbf16, #tpu.memory_space<vmem>>, vector<256x128xbf16>,
    return
  }
  func.func @transform_0(%arg0: i32) -> (i32, i32) {
    %c0_i32 = arith.constant 0 : i32
    %c0_i32_0 = arith.constant 0 : i32
    return %arg0, %c0_i32 : i32, i32
  }
  func.func @transform_1(%arg0: i32) -> (i32, i32) {
    %c0_i32 = arith.constant 0 : i32
    %c0_i32_0 = arith.constant 0 : i32
    %c0_i32_1 = arith.constant 0 : i32
    return %c0_i32, %c0_i32_0 : i32, i32
  }
  func.func @transform_2(%arg0: i32) -> (i32, i32) {
    %c0_i32 = arith.constant 0 : i32
    %c0_i32_0 = arith.constant 0 : i32
    return %arg0, %c0_i32 : i32, i32
  }
  func.func @transform_3(%arg0: i32) -> (i32, i32, i32) {
    %c0_i32 = arith.constant 0 : i32
    %c0_i32_0 = arith.constant 0 : i32
    %c0_i32_1 = arith.constant 0 : i32
    return %arg0, %c0_i32, %c0_i32_0 : i32, i32, i32
  }
}

</mosaic_0001>

<bundles_post_ra>
// kernel: tpu_custom_call.1
= control target key start
LH: loop header
LB: loop body
LE: loop exit
PB: predicated region body
PF: predicated region fallthrough
CT: control target
= control target key end

     0   :  { %9 = vsyncpa [#allocation3], 0  ;;  %s1934_s0 = inlined_call_operand.hbm [shape: bf16[512,128], index: 0, kind: input, shape index: {}]   ;;  %s1935_s1 = inlined_call_operand.hbm [shape: bf16[128,128], index: 1, kind: input, shape index: {}]   ;;  %s1936_s2 = inlined_call_operand.hbm [shape: bf16[512,128], index: 2, kind: output, shape index: {0}]   ;;  %s1937_s3 = inlined_call_operand.hbm [shape: f32[2,2,128], index: 3, kind: output, shape index: {1}]  }
   0x1   :  { %11 = vsyncpa [#allocation3 + $0x1], 0 }
   0x2   :  { %12 = vsyncpa [#allocation6], 0 }
   0x3   :  { %13 = vsyncpa [#allocation4], 0 }
   0x4   :  { %15 = vsyncpa [#allocation4 + $0x1], 0 }
   0x5   :  { %16 = vsyncpa [#allocation9], 0 }
   0x6   :  { %18 = vsyncpa [#allocation9 + $0x1], 0  ;;  %s1559_s12 = smov 0   ;;  %s1561_s13 = smov 0  }
   0x7   :  { %s1563_s14 = smov 0   ;;  %s1565_s15 = smov 0  }
   0x8 LB: > { %s1580_s16 = sadd.s32 4294967295, %s1529_s15   ;;  %s987_s17 = sadd.s32 4294967294, %s1529_s15   ;;  %s1529_s15 = sphi %s1565_s15, %s1957_s15   ;;  %s1525_s14 = sphi %s1563_s14, %s1956_s14   ;;  %s1521_s13 = sphi %s1561_s13, %s1955_s13   ;;  %s1517_s12 = sphi %s1559_s12, %s1954_s12  }
   0x9   : > { %p44_p0 = scmp.ne.s32.totalorder %s1521_s13, %s1517_s12  ;;  %p1938_p1 = scmp.eq.s32.totalorder %s1580_s16, 0 }
   0xa   : > { %p95_p3 = scmp.eq.s32.totalorder %s987_s17, 1  ;;  %p988_p5 = scmp.ge.s32.totalorder %s1529_s15, 1 }
   0xb   : > { %p1589_p4 = por %p1938_p1, %p44_p0  ;;  %p128_p7 = scmp.lt.s32.totalorder %s1529_s15, 3 }
   0xc   : > { %p1594_p6 = por %p95_p3, %p44_p0  ;;  %s1531_s21 = smov [#allocation5]  }
   0xd   : > { %s1941_s18 = scalar_select %p1589_p4, 1, 0 }
   0xe   : > { %s1942_s19 = scalar_select %p1594_p6, 1, 0 }
   0xf   : > { %p1599_p8 = pnand %p988_p5, %p128_p7  ;;  %s140_s22 = sshll.u32 %s1531_s21, 4  ;;  %s1603_s22 = int_to_ptr.vmem [resolvable:$true] %s140_s22 }
  0x10   : > { %s1615_s24 = sadd.s32 1, %s1529_s15   ;;  %s31_s25 = sadd.s32 1, %s1525_s14 }
  0x11   : > { %s1943_s20 = scalar_select %p1599_p8, 1, 0 }
  0x12   : > { %p1289_p9 = pneg %p1599_p8  ;;  %s28_s26 = ssub.s32 %s1529_s15, %s1615_s24 }
  0x13   : > { %s1369_s29 = scalar_lea.hbm %s1935_s1, 1024 }
  0x14   : > { %p1610_p11 = pnand %p1289_p9, %p1938_p1  ;;  %p1370_p12 = scmp.ne.s32.totalorder %s1935_s1, %s1369_s29 }
  0x15   : > { %p1376_p5 = scmp.lt.u32.totalorder %s1369_s29, %s1935_s1 }
  0x16   : > { %p1371_p13 = pneg %p1610_p11 }
  0x18   : > { %p1372_p0 = pnand %p1371_p13, %p1370_p12 }
  0x1a   : > { %p1373_p3 = pneg %p1372_p0 }
  0x1c   : > { %p1378_p7 = pnand %p1376_p5, %p1373_p3 }
  0x1e   : > { %1381 = shalt.err (!%p1378_p7)
}
  0x1f   : > { %s1382_s7 = scalar_lea.vmem %s1603_s22, 1024  ;;  %p1390_p2 = scmp.lt.s32.totalorder %s1603_s22, %s1603_s22 }
  0x20   : > { %p1383_p9 = scmp.ne.s32.totalorder %s1603_s22, %s1382_s7  ;;  %p1391_p6 = scmp.lt.s32.totalorder %s1382_s7, %s1382_s7 }
  0x22   : > { %p1385_p10 = pnand %p1383_p9, %p1371_p13  ;;  %p1392_p4 = por %p1391_p6, %p1390_p2 }
  0x24   : > { %p1386_p1 = pneg %p1385_p10 }
  0x26   : > { %p1393_p8 = pnand %p1392_p4, %p1386_p1 }
  0x28   : > { %1396 = shalt.err (!%p1393_p8)
}
  0x29   : > { %s1532_s8 = smov 64   ;;  %s1533_s9 = smov 4  }
  0x2a   : > { %1292 = dma.hbm_to_vmem [thread:$0]  (!%p1610_p11), %s1935_s1, 1024, %s1603_s22, [#allocation6], %s1532_s8, %s1532_s8, %s1533_s9  }
  0x2b   : > { %p29_p1 = scmp.eq.s32.totalorder %s28_s26, 0  ;;  %p38_p2 = scmp.ne.s32.totalorder %s1525_s14, %s1521_s13 }
  0x2c   : > { %p39_p4 = scmp.eq.s32.totalorder %s1529_s15, 0  ;;  %p1305_p6 = scmp.lt.s32.totalorder %s1529_s15, 2 }
  0x2d   : > { %s1649_s17 = scalar_select %p29_p1, %s1525_s14, %s31_s25  }
  0x2e   : > { %p40_p8 = por %p39_p4, %p38_p2  ;;  %p1945_p10 = scmp.eq.s32.totalorder %s1580_s16, 1 }
  0x2f   : > { %s154_s23 = sand.u32 1, %s1525_s14   ;;  %s1062_s27 = sshll.u32 %s1529_s15, 11 }
  0x30   : > { %p1653_p12 = por %p1945_p10, %p38_p2  ;;  %s991_s28 = sshll.u32 %s154_s23, 7 }
  0x31   : > { %s1662_s4 = scalar_lea.hbm %s1934_s0, %s1062_s27  ;;  %s158_s22 = scalar_lea.vmem [#allocation2], %s991_s28 }
  0x32   : > { %s165_s25 = sshll.u32 %s158_s22, 4  ;;  %p1664_p11 = pnand %p1305_p6, %p40_p8  ;;  %s1668_s25 = int_to_ptr.vmem [resolvable:$true] %s165_s25 }
  0x33   : > { %s1670_s5 = scalar_lea.sflag [#allocation3], %s154_s23  ;;  %s1397_s6 = scalar_lea.hbm %s1662_s4, 2048 }
  0x34   : > { %p1398_p13 = scmp.ne.s32.totalorder %s1662_s4, %s1397_s6  ;;  %p1399_p0 = pneg %p1664_p11 }
  0x35   : > { %s1402_s11 = scalar_lea.hbm %s1934_s0, 4096  ;;  %p1403_p7 = scmp.lt.u32.totalorder %s1662_s4, %s1934_s0 }
  0x36   : > { %p1400_p3 = pnand %p1399_p0, %p1398_p13  ;;  %p1404_p9 = scmp.lt.u32.totalorder %s1402_s11, %s1397_s6 }
  0x37   : > { %p1406_p2 = scmp.lt.u32.totalorder %s1397_s6, %s1662_s4 }
  0x38   : > { %p1401_p5 = pneg %p1400_p3  ;;  %p1405_p1 = por %p1404_p9, %p1403_p7 }
  0x3a   : > { %p1407_p4 = por %p1406_p2, %p1405_p1 }
  0x3c   : > { %p1408_p6 = pnand %p1407_p4, %p1401_p5 }
  0x3e   : > { %1411 = shalt.err (!%p1408_p6)
}
  0x3f   : > { %s1412_s23 = scalar_lea.vmem %s1668_s25, 2048  ;;  %s1534_s29 = smov [#allocation2]  }
  0x40   : > { %p1413_p8 = scmp.ne.s32.totalorder %s1668_s25, %s1412_s23  ;;  %s1417_s30 = sshll.u32 %s1534_s29, 4  ;;  %s1418_s30 = int_to_ptr.vmem [resolvable:$false] %s1417_s30 }
  0x41   : > { %s1419_s22 = scalar_lea.vmem %s1418_s30, 4096  ;;  %p1420_p3 = scmp.lt.s32.totalorder %s1668_s25, %s1418_s30 }
  0x42   : > { %p1415_p10 = pnand %p1413_p8, %p1399_p0  ;;  %p1421_p7 = scmp.lt.s32.totalorder %s1419_s22, %s1412_s23 }
  0x44   : > { %p1416_p13 = pneg %p1415_p10  ;;  %p1422_p9 = por %p1421_p7, %p1420_p3 }
  0x46   : > { %p1423_p1 = pnand %p1422_p9, %p1416_p13 }
  0x48   : > { %1426 = shalt.err (!%p1423_p1)
}
  0x49   : > { %1296 = dma.hbm_to_vmem [thread:$0]  (!%p1664_p11), %s1662_s4, 2048, %s1668_s25, %s1670_s5, %s1532_s8, %s1532_s8, %s1533_s9  }
  0x4a   : > { %p1948_p0 = scmp.ne.s32.totalorder %s1943_s20, 0 }
  0x4b   : > { %s1704_s6 = sand.u32 (!%p1948_p0), 1, %s1521_s13   ;;  %p1949_p5 = scmp.ne.s32.totalorder (!%p1948_p0), %s1941_s18, 0 }
  0x4c   : > { %177 = sbr.rel (%p1948_p0) target bundleno = 437 (0x1b5), region = 28  ;;  %s995_s7 = sshll.u32 (!%p1948_p0), %s1704_s6, 7 }
  0x4d   : > { %s180_s10 = scalar_lea.sflag (!%p1948_p0), [#allocation3], %s1704_s6  ;;  %s1710_s26 = scalar_lea.vmem (!%p1948_p0), [#allocation2], %s995_s7 }
  0x53   : > { %1500 = dma.done.wait (%p1949_p5), %s180_s10, 2048  }
  0x54   : > { %1502 = vsyncadd (%p1949_p5), %s180_s10, 4294965248  ;;  %p1950_p11 = scmp.eq.s32.totalorder %s1580_s16, 0 }
  0x56   : > { %1504 = dma.done.wait (%p1950_p11), [#allocation6], 1024   ;;  %p1951_p2 = pmov %p1950_p11 }
  0x57   : > { %v1345_v0 = vld [vmem:[#allocation5] sm:$0xff]   ;;  %v1346_v1 = vld [vmem:[#allocation5 + $0x8] sm:$0xff]   ;;  %v1347_v2 = vld [vmem:[#allocation5 + $0x10] sm:$0xff]   ;;  %s1748_s18 = scalar_lea.vmem [#allocation7], %s995_s7  ;;  %s1095_s20 = sshll.u32 %s1580_s16, 11 }
  0x58   : > { %1506 = vsyncadd (%p1951_p2), [#allocation6], 4294966272  ;;  %1215 = vmatprep.subr.bf16.mxu0 %v1345_v0  ;;  %1263 = vmatprep.subr.bf16.mxu1 %v1345_v0  ;;  %v1348_v3 = vld [vmem:[#allocation5 + $0x18] sm:$0xff]   ;;  %v1353_v4 = vld [vmem:[%s1710_s26] sm:$0xff]   ;;  %s859_s8 = sshll.u32 %s1748_s18, 4  ;;  %s1803_s25 = scalar_lea.hbm %s1936_s2, %s1095_s20  ;;  %s1805_s8 = int_to_ptr.vmem [resolvable:$true] %s859_s8 }
  0x59   : > { %1216 = vmatpush3.bf16.msra.mxu0 %v1345_v0  ;;  %1271 = vmatpush3.bf16.msra.mxu1 %v1345_v0  ;;  %v1349_v5 = vld [vmem:[#allocation5 + $0x20] sm:$0xff]   ;;  %v1350_v6 = vld [vmem:[#allocation5 + $0x28] sm:$0xff]   ;;  %v1351_v8 = vld [vmem:[#allocation5 + $0x30] sm:$0xff]   ;;  %s841_s5 = scalar_lea.sflag [#allocation4], %s1704_s6  ;;  %s1427_s11 = scalar_lea.vmem %s1805_s8, 2048 }
  0x5a   : > { %1217 = vmatprep.subr.bf16.mxu0 %v1346_v1  ;;  %1264 = vmatprep.subr.bf16.mxu1 %v1346_v1  ;;  %v1361_v7 = vld [vmem:[%s1710_s26 + $0x40] sm:$0xff]   ;;  %v1352_v9 = vld [vmem:[#allocation5 + $0x38] sm:$0xff]   ;;  %v1354_v10 = vld [vmem:[%s1710_s26 + $0x8] sm:$0xff]   ;;  %p1428_p4 = scmp.ne.s32.totalorder %s1805_s8, %s1427_s11  ;;  %s1535_s27 = smov [#allocation7]  }
  0x5b   : > { %1231 = vmatprep.mubr.bf16.mxu0 %v1353_v4  ;;  %1247 = vmatprep.mubr.bf16.mxu1 %v1361_v7  ;;  %v1362_v11 = vld [vmem:[%s1710_s26 + $0x48] sm:$0xff]   ;;  %v1355_v12 = vld [vmem:[%s1710_s26 + $0x10] sm:$0xff]   ;;  %v1356_v14 = vld [vmem:[%s1710_s26 + $0x18] sm:$0xff]   ;;  %s1431_s28 = sshll.u32 %s1535_s27, 4  ;;  %s1432_s28 = int_to_ptr.vmem [resolvable:$false] %s1431_s28 }
  0x5c   : > { %v1363_v13 = vld [vmem:[%s1710_s26 + $0x50] sm:$0xff]   ;;  %v1364_v15 = vld [vmem:[%s1710_s26 + $0x58] sm:$0xff]   ;;  %v1357_v16 = vld [vmem:[%s1710_s26 + $0x20] sm:$0xff]   ;;  %p1429_p6 = pnand %p1428_p4, %p1653_p12  ;;  %s1433_s23 = scalar_lea.vmem %s1432_s28, 4096 }
  0x5d   : > { %1218 = vmatpush3.bf16.msra.mxu0 %v1346_v1  ;;  %1272 = vmatpush3.bf16.msra.mxu1 %v1346_v1  ;;  %v1365_v17 = vld [vmem:[%s1710_s26 + $0x60] sm:$0xff]   ;;  %v1358_v18 = vld [vmem:[%s1710_s26 + $0x28] sm:$0xff]   ;;  %v1359_v20 = vld [vmem:[%s1710_s26 + $0x30] sm:$0xff]   ;;  %p1434_p10 = scmp.lt.s32.totalorder %s1805_s8, %s1432_s28  ;;  %p1435_p13 = scmp.lt.s32.totalorder %s1433_s23, %s1427_s11 }
  0x5e   : > { %1219 = vmatprep.subr.bf16.mxu0 %v1347_v2  ;;  %1265 = vmatprep.subr.bf16.mxu1 %v1347_v2  ;;  %v1366_v19 = vld [vmem:[%s1710_s26 + $0x68] sm:$0xff]   ;;  %v1367_v21 = vld [vmem:[%s1710_s26 + $0x70] sm:$0xff]   ;;  %v1360_v22 = vld [vmem:[%s1710_s26 + $0x38] sm:$0xff]   ;;  %p1430_p8 = pneg %p1429_p6 }
  0x5f   : > { %v1368_v23 = vld [vmem:[%s1710_s26 + $0x78] sm:$0xff]   ;;  %p1436_p3 = por %p1435_p13, %p1434_p10 }
  0x61   : > { %1220 = vmatpush3.bf16.msra.mxu0 %v1347_v2  ;;  %1273 = vmatpush3.bf16.msra.mxu1 %v1347_v2  ;;  %p1437_p7 = pnand %p1436_p3, %p1430_p8 }
  0x62   : > { %1221 = vmatprep.subr.bf16.mxu0 %v1348_v3  ;;  %1266 = vmatprep.subr.bf16.mxu1 %v1348_v3 }
  0x65   : > { %1222 = vmatpush3.bf16.msra.mxu0 %v1348_v3  ;;  %1274 = vmatpush3.bf16.msra.mxu1 %v1348_v3 }
  0x66   : > { %1223 = vmatprep.subr.bf16.mxu0 %v1349_v5  ;;  %1267 = vmatprep.subr.bf16.mxu1 %v1349_v5 }
  0x69   : > { %1224 = vmatpush3.bf16.msra.mxu0 %v1349_v5  ;;  %1275 = vmatpush3.bf16.msra.mxu1 %v1349_v5 }
  0x6a   : > { %1225 = vmatprep.subr.bf16.mxu0 %v1350_v6  ;;  %1268 = vmatprep.subr.bf16.mxu1 %v1350_v6 }
  0x6d   : > { %1226 = vmatpush3.bf16.msra.mxu0 %v1350_v6  ;;  %1276 = vmatpush3.bf16.msra.mxu1 %v1350_v6 }
  0x6e   : > { %1227 = vmatprep.subr.bf16.mxu0 %v1351_v8  ;;  %1269 = vmatprep.subr.bf16.mxu1 %v1351_v8 }
  0x71   : > { %1228 = vmatpush3.bf16.msra.mxu0 %v1351_v8  ;;  %1277 = vmatpush3.bf16.msra.mxu1 %v1351_v8 }
  0x72   : > { %1229 = vmatprep.subr.bf16.mxu0 %v1352_v9  ;;  %1270 = vmatprep.subr.bf16.mxu1 %v1352_v9 }
  0x75   : > { %1230 = vmatpush3.bf16.msra.mxu0 %v1352_v9  ;;  %1278 = vmatpush3.bf16.msra.mxu1 %v1352_v9 }
  0x78   : > { %1232 = vmatmul.mubr.bf16.vlgmr.msra.gmra.mrb[0].mxu0 %v1354_v10  ;;  %1248 = vmatmul.mubr.bf16.vlgmr.msra.gmra.mrb[0].mxu1 %v1362_v11 }
  0x79   : > { %1235 = vmatprep.mubr.bf16.mxu0 %v1355_v12  ;;  %1251 = vmatprep.mubr.bf16.mxu1 %v1363_v13 }
  0x80   : > { %1236 = vmatmul.mubr.bf16.gmra.mrb[4].mxu0 %v1356_v14  ;;  %1252 = vmatmul.mubr.bf16.gmra.mrb[4].mxu1 %v1364_v15 }
  0x81   : > { %1239 = vmatprep.mubr.bf16.mxu0 %v1357_v16  ;;  %1255 = vmatprep.mubr.bf16.mxu1 %v1365_v17 }
  0x88   : > { %1240 = vmatmul.mubr.bf16.gmra.mrb[8].mxu0 %v1358_v18  ;;  %1256 = vmatmul.mubr.bf16.gmra.mrb[8].mxu1 %v1366_v19 }
  0x89   : > { %1243 = vmatprep.mubr.bf16.mxu0 %v1359_v20  ;;  %1259 = vmatprep.mubr.bf16.mxu1 %v1367_v21 }
  0x90   : > { %1244 = vmatmul.mubr.bf16.gmra.mrb[12].mxu0 %v1360_v22  ;;  %1260 = vmatmul.mubr.bf16.gmra.mrb[12].mxu1 %v1368_v23 }
 0x14b   : > { %v1233_v24 = vpop.f32.mrb[0].mxu0  ;;  %v1736_v25 = vpop.f32.mrb[0].mxu1 }
 0x14c   : > { %v444_v26 = vpop.f32.mrb[1].mxu0  ;;  %v1738_v27 = vpop.f32.mrb[1].mxu1  ;;  %v610_v39 = vmul.f32 %v1233_v24, %v1233_v24 }
 0x14d   : > { %v1234_v28 = vpop.f32.mrb[2].mxu0  ;;  %v1740_v29 = vpop.f32.mrb[2].mxu1  ;;  %v608_v34 = vmul.f32 %v444_v26, %v444_v26 }
 0x14e   : > { %v1104_v30 = vpack.c.bf16 %v1234_v28, %v1233_v24  ;;  %v447_v31 = vpop.f32.mrb[3].mxu0  ;;  %v1144_v32 = vpack.c.bf16 %v1740_v29, %v1736_v25  ;;  %v1744_v33 = vpop.f32.mrb[3].mxu1  ;;  %v611_v42 = vmul.f32 %v1234_v28, %v1234_v28 }
 0x14f   : > { %v571_v35 = vadd.f32 %v447_v31, %v444_v26  ;;  %v609_v36 = vmul.f32 %v447_v31, %v447_v31  ;;  %v1099_v37 = vpack.c.bf16 %v447_v31, %v444_v26  ;;  %v1139_v38 = vpack.c.bf16 %v1744_v33, %v1738_v27 }
 0x150   : > { %1176 = vst [vmem:[%s1748_s18 + $0x8] sm:$0xff] %v1104_v30   ;;  %1184 = vst [vmem:[%s1748_s18 + $0x48] sm:$0xff] %v1144_v32  }
 0x151   : > { %v572_v40 = vadd.f32 %v1233_v24, %v571_v35  ;;  %v640_v41 = vadd.f32 %v609_v36, %v608_v34  ;;  %1100 = vst [vmem:[%s1748_s18] sm:$0xff] %v1099_v37   ;;  %1183 = vst [vmem:[%s1748_s18 + $0x40] sm:$0xff] %v1139_v38  }
 0x153   : > { %v641_v43 = vadd.f32 %v640_v41, %v610_v39  ;;  %v1237_v44 = vpop.f32.mrb[4].mxu0  ;;  %v573_v45 = vadd.f32 %v1234_v28, %v572_v40  ;;  %v1756_v46 = vpop.f32.mrb[4].mxu1 }
 0x154   : > { %v460_v47 = vpop.f32.mrb[5].mxu0  ;;  %v1758_v48 = vpop.f32.mrb[5].mxu1  ;;  %v614_v63 = vmul.f32 %v1237_v44, %v1237_v44 }
 0x155   : > { %v574_v49 = vadd.f32 %v573_v45, %v460_v47  ;;  %v612_v50 = vmul.f32 %v460_v47, %v460_v47  ;;  %v642_v51 = vadd.f32 %v641_v43, %v611_v42  ;;  %v1238_v52 = vpop.f32.mrb[6].mxu0  ;;  %v1760_v53 = vpop.f32.mrb[6].mxu1 }
 0x156   : > { %v1114_v54 = vpack.c.bf16 %v1238_v52, %v1237_v44  ;;  %v463_v55 = vpop.f32.mrb[7].mxu0  ;;  %v1154_v56 = vpack.c.bf16 %v1760_v53, %v1756_v46  ;;  %v1764_v57 = vpop.f32.mrb[7].mxu1  ;;  %v615_v2 = vmul.f32 %v1238_v52, %v1238_v52 }
 0x157   : > { %v643_v58 = vadd.f32 %v642_v51, %v612_v50  ;;  %v575_v59 = vadd.f32 %v574_v49, %v463_v55  ;;  %v613_v60 = vmul.f32 %v463_v55, %v463_v55  ;;  %v1109_v61 = vpack.c.bf16 %v463_v55, %v460_v47 }
 0x158   : > { %1178 = vst [vmem:[%s1748_s18 + $0x18] sm:$0xff] %v1114_v54   ;;  %1186 = vst [vmem:[%s1748_s18 + $0x58] sm:$0xff] %v1154_v56   ;;  %v1149_v62 = vpack.c.bf16 %v1764_v57, %v1758_v48 }
 0x159   : > { %v576_v0 = vadd.f32 %v1237_v44, %v575_v59  ;;  %v644_v1 = vadd.f32 %v643_v58, %v613_v60  ;;  %1177 = vst [vmem:[%s1748_s18 + $0x10] sm:$0xff] %v1109_v61   ;;  %v624_v61 = vmul.f32 %v1738_v27, %v1738_v27 }
 0x15a   : > { %1185 = vst [vmem:[%s1748_s18 + $0x50] sm:$0xff] %v1149_v62  }
 0x15b   : > { %v645_v3 = vadd.f32 %v644_v1, %v614_v63  ;;  %v1241_v4 = vpop.f32.mrb[8].mxu0  ;;  %v577_v5 = vadd.f32 %v1238_v52, %v576_v0  ;;  %v1772_v6 = vpop.f32.mrb[8].mxu1 }
 0x15c   : > { %v476_v7 = vpop.f32.mrb[9].mxu0  ;;  %v1774_v8 = vpop.f32.mrb[9].mxu1  ;;  %v618_v23 = vmul.f32 %v1241_v4, %v1241_v4 }
 0x15d   : > { %v578_v9 = vadd.f32 %v577_v5, %v476_v7  ;;  %v616_v10 = vmul.f32 %v476_v7, %v476_v7  ;;  %v646_v11 = vadd.f32 %v645_v3, %v615_v2  ;;  %v1242_v12 = vpop.f32.mrb[10].mxu0  ;;  %v1776_v13 = vpop.f32.mrb[10].mxu1 }
 0x15e   : > { %v1124_v14 = vpack.c.bf16 %v1242_v12, %v1241_v4  ;;  %v479_v15 = vpop.f32.mrb[11].mxu0  ;;  %v1164_v16 = vpack.c.bf16 %v1776_v13, %v1772_v6  ;;  %v1780_v17 = vpop.f32.mrb[11].mxu1  ;;  %v619_v28 = vmul.f32 %v1242_v12, %v1242_v12 }
 0x15f   : > { %v647_v18 = vadd.f32 %v646_v11, %v616_v10  ;;  %v579_v19 = vadd.f32 %v578_v9, %v479_v15  ;;  %v617_v20 = vmul.f32 %v479_v15, %v479_v15  ;;  %v1119_v21 = vpack.c.bf16 %v479_v15, %v476_v7 }
 0x160   : > { %1180 = vst [vmem:[%s1748_s18 + $0x28] sm:$0xff] %v1124_v14   ;;  %1188 = vst [vmem:[%s1748_s18 + $0x68] sm:$0xff] %v1164_v16   ;;  %v1159_v22 = vpack.c.bf16 %v1780_v17, %v1774_v8 }
 0x161   : > { %v580_v24 = vadd.f32 %v1241_v4, %v579_v19  ;;  %v648_v26 = vadd.f32 %v647_v18, %v617_v20  ;;  %1179 = vst [vmem:[%s1748_s18 + $0x20] sm:$0xff] %v1119_v21  }
 0x162   : > { %1187 = vst [vmem:[%s1748_s18 + $0x60] sm:$0xff] %v1159_v22  }
 0x163   : > { %v649_v30 = vadd.f32 %v648_v26, %v618_v23  ;;  %v1245_v31 = vpop.f32.mrb[12].mxu0  ;;  %v581_v32 = vadd.f32 %v1242_v12, %v580_v24  ;;  %v1788_v34 = vpop.f32.mrb[12].mxu1 }
 0x164   : > { %v492_v35 = vpop.f32.mrb[13].mxu0  ;;  %v1790_v36 = vpop.f32.mrb[13].mxu1  ;;  %v622_v54 = vmul.f32 %v1245_v31, %v1245_v31 }
 0x165   : > { %v582_v37 = vadd.f32 %v581_v32, %v492_v35  ;;  %v620_v38 = vmul.f32 %v492_v35, %v492_v35  ;;  %v650_v39 = vadd.f32 %v649_v30, %v619_v28  ;;  %v1246_v40 = vpop.f32.mrb[14].mxu0  ;;  %v1794_v41 = vpop.f32.mrb[14].mxu1 }
 0x166   : > { %v1134_v42 = vpack.c.bf16 %v1246_v40, %v1245_v31  ;;  %v495_v43 = vpop.f32.mrb[15].mxu0  ;;  %v1174_v44 = vpack.c.bf16 %v1794_v41, %v1788_v34  ;;  %v1798_v45 = vpop.f32.mrb[15].mxu1  ;;  %v623_v58 = vmul.f32 %v1246_v40, %v1246_v40 }
 0x167   : > { %v651_v47 = vadd.f32 %v650_v39, %v620_v38  ;;  %v583_v49 = vadd.f32 %v582_v37, %v495_v43  ;;  %v621_v50 = vmul.f32 %v495_v43, %v495_v43  ;;  %v1129_v51 = vpack.c.bf16 %v495_v43, %v492_v35 }
 0x168   : > { %1182 = vst [vmem:[%s1748_s18 + $0x38] sm:$0xff] %v1134_v42   ;;  %1190 = vst [vmem:[%s1748_s18 + $0x78] sm:$0xff] %v1174_v44   ;;  %v1169_v52 = vpack.c.bf16 %v1798_v45, %v1790_v36 }
 0x169   : > { %v584_v55 = vadd.f32 %v1245_v31, %v583_v49  ;;  %v652_v56 = vadd.f32 %v651_v47, %v621_v50  ;;  %1181 = vst [vmem:[%s1748_s18 + $0x30] sm:$0xff] %v1129_v51  }
 0x16a   : > { %1189 = vst [vmem:[%s1748_s18 + $0x70] sm:$0xff] %v1169_v52  }
 0x16b   : > { %v653_v59 = vadd.f32 %v652_v56, %v622_v54  ;;  %v585_v60 = vadd.f32 %v1246_v40, %v584_v55 }
 0x16c   : > { %1440 = shalt.err (!%p1437_p7)
}
 0x16d   : > { %s1441_s29 = scalar_lea.hbm %s1803_s25, 2048  ;;  %s1445_s7 = scalar_lea.hbm %s1936_s2, 4096 }
 0x16e   : > { %p1442_p9 = scmp.ne.s32.totalorder %s1803_s25, %s1441_s29  ;;  %p1446_p5 = scmp.lt.u32.totalorder %s1803_s25, %s1936_s2 }
 0x16f   : > { %p1447_p11 = scmp.lt.u32.totalorder %s1445_s7, %s1441_s29  ;;  %p1449_p4 = scmp.lt.u32.totalorder %s1441_s29, %s1803_s25 }
 0x170   : > { %p1443_p1 = pnand %p1442_p9, %p1653_p12 }
 0x171   : > { %p1448_p2 = por %p1447_p11, %p1446_p5 }
 0x172   : > { %p1444_p0 = pneg %p1443_p1 }
 0x173   : > { %p1450_p6 = por %p1449_p4, %p1448_p2 }
 0x175   : > { %p1451_p8 = pnand %p1450_p6, %p1444_p0 }
 0x177   : > { %1454 = shalt.err (!%p1451_p8)
}
 0x178   : > { %s1536_s18 = smov 64   ;;  %s1537_s20 = smov 4   ;;  %v586_v62 = vadd.f32 %v585_v60, %v1738_v27  ;;  %v654_v63 = vadd.f32 %v653_v59, %v623_v58  ;;  %v625_v2 = vmul.f32 %v1744_v33, %v1744_v33  ;;  %v626_v3 = vmul.f32 %v1736_v25, %v1736_v25 }
 0x179   : > { %1285 = dma.vmem_to_hbm [thread:$0]  (%p1653_p12), %s1805_s8, 2048, %s1803_s25, %s841_s5, %s1536_s18, %s1536_s18, %s1537_s20   ;;  %v627_v7 = vmul.f32 %v1740_v29, %v1740_v29  ;;  %v628_v27 = vmul.f32 %v1758_v48, %v1758_v48  ;;  %v629_v15 = vmul.f32 %v1764_v57, %v1764_v57  ;;  %v633_v24 = vmul.f32 %v1780_v17, %v1780_v17 }
 0x17a   : > { %v655_v0 = vadd.f32 %v654_v63, %v624_v61  ;;  %v587_v1 = vadd.f32 %v586_v62, %v1744_v33  ;;  %v638_v38 = vmul.f32 %v1788_v34, %v1788_v34  ;;  %s998_s8 = sshll.u32 %s1704_s6, 1  ;;  %s1059_s9 = sshll.u32 %s1580_s16, 5  ;;  %vm677_vm0 = vcmask 1040384  }
 0x17b   : > { %s214_s4 = scalar_lea.vmem [#allocation8], %s998_s8  ;;  %s1890_s27 = scalar_lea.hbm %s1937_s3, %s1059_s9 }
 0x17c   : > { %v588_v4 = vadd.f32 %v1736_v25, %v587_v1  ;;  %v656_v5 = vadd.f32 %v655_v0, %v625_v2  ;;  %v630_v25 = vmul.f32 %v1756_v46, %v1756_v46  ;;  %s875_s25 = sshll.u32 %s214_s4, 4  ;;  %s846_s28 = scalar_lea.sflag [#allocation9], %s1704_s6  ;;  %s1892_s25 = int_to_ptr.vmem [resolvable:$true] %s875_s25 }
 0x17d   : > { %s1455_s23 = scalar_lea.vmem %s1892_s25, 32  ;;  %s1538_s16 = smov [#allocation8]  }
 0x17e   : > { %v657_v9 = vadd.f32 %v656_v5, %v626_v3  ;;  %v589_v10 = vadd.f32 %v1740_v29, %v588_v4  ;;  %v631_v29 = vmul.f32 %v1760_v53, %v1760_v53  ;;  %p1456_p10 = scmp.ne.s32.totalorder %s1892_s25, %s1455_s23  ;;  %s1459_s29 = sshll.u32 %s1538_s16, 4  ;;  %s1460_s29 = int_to_ptr.vmem [resolvable:$false] %s1459_s29 }
 0x17f   : > { %s1461_s30 = scalar_lea.vmem %s1460_s29, 64  ;;  %p1462_p7 = scmp.lt.s32.totalorder %s1892_s25, %s1460_s29 }
 0x180   : > { %v590_v11 = vadd.f32 %v589_v10, %v1758_v48  ;;  %v658_v12 = vadd.f32 %v657_v9, %v627_v7  ;;  %v632_v48 = vmul.f32 %v1774_v8, %v1774_v8  ;;  %p1457_p13 = pnand %p1456_p10, %p1653_p12  ;;  %p1463_p9 = scmp.lt.s32.totalorder %s1461_s30, %s1455_s23 }
 0x182   : > { %v659_v14 = vadd.f32 %v658_v12, %v628_v27  ;;  %v591_v33 = vadd.f32 %v590_v11, %v1764_v57  ;;  %p1458_p3 = pneg %p1457_p13  ;;  %p1464_p1 = por %p1463_p9, %p1462_p7 }
 0x184   : > { %v592_v16 = vadd.f32 %v1756_v46, %v591_v33  ;;  %v660_v18 = vadd.f32 %v659_v14, %v629_v15  ;;  %v634_v46 = vmul.f32 %v1772_v6, %v1772_v6  ;;  %p1465_p0 = pnand %p1464_p1, %p1458_p3 }
 0x186   : > { %v661_v19 = vadd.f32 %v660_v18, %v630_v25  ;;  %v593_v20 = vadd.f32 %v1760_v53, %v592_v16  ;;  %v635_v53 = vmul.f32 %v1776_v13, %v1776_v13 }
 0x188   : > { %v594_v21 = vadd.f32 %v593_v20, %v1774_v8  ;;  %v662_v22 = vadd.f32 %v661_v19, %v631_v29  ;;  %v636_v8 = vmul.f32 %v1790_v36, %v1790_v36 }
 0x18a   : > { %v663_v23 = vadd.f32 %v662_v22, %v632_v48  ;;  %v595_v57 = vadd.f32 %v594_v21, %v1780_v17 }
 0x18c   : > { %v596_v26 = vadd.f32 %v1772_v6, %v595_v57  ;;  %v664_v28 = vadd.f32 %v663_v23, %v633_v24  ;;  %v637_v6 = vmul.f32 %v1798_v45, %v1798_v45 }
 0x18e   : > { %v665_v30 = vadd.f32 %v664_v28, %v634_v46  ;;  %v597_v31 = vadd.f32 %v1776_v13, %v596_v26  ;;  %v639_v13 = vmul.f32 %v1794_v41, %v1794_v41 }
 0x190   : > { %v598_v32 = vadd.f32 %v597_v31, %v1790_v36  ;;  %v666_v35 = vadd.f32 %v665_v30, %v635_v53 }
 0x192   : > { %v667_v17 = vadd.f32 %v666_v35, %v636_v8  ;;  %v599_v37 = vadd.f32 %v598_v32, %v1798_v45 }
 0x194   : > { %v600_v39 = vadd.f32 %v1788_v34, %v599_v37  ;;  %v668_v40 = vadd.f32 %v667_v17, %v637_v6 }
 0x196   : > { %v601_v36 = vadd.f32 %v1794_v41, %v600_v39  ;;  %v669_v42 = vadd.f32 %v668_v40, %v638_v38 }
 0x198   : > { %v602_v43 = vrot.slane %v601_v36, 4  ;;  %v670_v44 = vadd.f32 %v669_v42, %v639_v13 }
 0x19a   : > { %v603_v47 = vadd.f32 %v602_v43, %v601_v36  ;;  %v671_v49 = vrot.slane %v670_v44, 4 }
 0x19c   : > { %v604_v50 = vrot.slane %v603_v47, 2  ;;  %v672_v51 = vadd.f32 %v671_v49, %v670_v44 }
 0x19e   : > { %v605_v45 = vadd.f32 %v604_v50, %v603_v47  ;;  %v673_v52 = vrot.slane %v672_v51, 2 }
 0x1a0   : > { %v606_v54 = vrot.slane %v605_v45, 1  ;;  %v674_v34 = vadd.f32 %v673_v52, %v672_v51 }
 0x1a2   : > { %v675_v55 = vrot.slane %v674_v34, 1  ;;  %v607_v41 = vadd.f32 %v606_v54, %v605_v45 }
 0x1a4   : > { %v676_v56 = vadd.f32 %v675_v55, %v674_v34 }
 0x1a6   : > { %v678_v58 = vsel %vm677_vm0, %v607_v41, %v676_v56 }
 0x1a7   : > { %679 = vst [vmem:[%s214_s4] sm:$0x3] %v678_v58 }
 0x1a8   : > { %1468 = shalt.err (!%p1465_p0)
}
 0x1a9   : > { %s1469_s6 = scalar_lea.hbm %s1890_s27, 32  ;;  %s1473_s10 = scalar_lea.hbm %s1937_s3, 64 }
 0x1aa   : > { %p1470_p5 = scmp.ne.s32.totalorder %s1890_s27, %s1469_s6  ;;  %p1474_p4 = scmp.lt.u32.totalorder %s1890_s27, %s1937_s3 }
 0x1ab   : > { %p1475_p6 = scmp.lt.u32.totalorder %s1473_s10, %s1469_s6  ;;  %p1477_p10 = scmp.lt.u32.totalorder %s1469_s6, %s1890_s27 }
 0x1ac   : > { %p1471_p11 = pnand %p1470_p5, %p1653_p12 }
 0x1ad   : > { %p1476_p8 = por %p1475_p6, %p1474_p4 }
 0x1ae   : > { %p1472_p2 = pneg %p1471_p11 }
 0x1af   : > { %p1478_p13 = por %p1477_p10, %p1476_p8 }
 0x1b1   : > { %p1479_p3 = pnand %p1478_p13, %p1472_p2 }
 0x1b3   : > { %1482 = shalt.err (!%p1479_p3)
}
 0x1b4   : > { %1286 = dma.vmem_to_hbm [thread:$0]  (%p1653_p12), %s1892_s25, 32, %s1890_s27, %s846_s28  }
 0x1b5 PF: > { %s887_s20 = sand.u32 1, %s1517_s12   ;;  %p1952_p7 = scmp.ne.s32.totalorder %s1942_s19, 0 }
 0x1b6   : > { %p1953_p9 = scmp.ge.s32.totalorder %s1529_s15, 2  ;;  %s888_s8 = scalar_lea.sflag [#allocation4], %s887_s20 }
 0x1b8   : > { %p1298_p1 = pnand %p1953_p9, %p1952_p7 }
 0x1ba   : > { %1508 = dma.done.wait (!%p1298_p1), %s888_s8, 2048  }
 0x1bb   : > { %1510 = vsyncadd (!%p1298_p1), %s888_s8, 4294965248  ;;  %s897_s9 = scalar_lea.sflag [#allocation9], %s887_s20 }
 0x1bc   : > { %1512 = dma.done.wait (!%p1298_p1), %s897_s9, 32  }
 0x1bd   : > { %1514 = vsyncadd (!%p1298_p1), %s897_s9, 4294967264  ;;  %p21_p12 = scmp.ge.s32.totalorder %s1615_s24, 4   ;;  %s1954_s12 = smov %s1521_s13 }
 0x1be   : > { %s1955_s13 = smov %s1525_s14  ;;  %s1956_s14 = smov %s1649_s17 }
 0x1bf   : > { %s1957_s15 = smov %s1615_s24  ;;  %23 = sbr.rel (!%p21_p12) target bundleno = 8 (0x8), region = 94 }
 0x1c6   :  { %902 = vsyncpa [#allocation3], 1 }
 0x1c7   :  { %904 = vsyncpa [#allocation3 + $0x1], 1 }
 0x1c8   :  { %905 = vsyncpa [#allocation6], 1 }
 0x1c9   :  { %906 = vsyncpa [#allocation4], 1 }
 0x1ca   :  { %908 = vsyncpa [#allocation4 + $0x1], 1 }
 0x1cb   :  { %909 = vsyncpa [#allocation9], 1 }
 0x1cc   :  { %911 = vsyncpa [#allocation9 + $0x1], 1 }

</bundles_post_ra>
